<compile_context>
chip_gen: v7x
topology: tpu7x:2x2x1
jax: 0.10.0
libtpu: 0.0.40
codegen_flags: <defaults>
</compile_context>

<pallas_src>
import jax
import jax.numpy as jnp
from jax.experimental import pallas as pl
from jax.experimental.pallas import tpu as pltpu


def _attn_agg_kernel(x_ref, q_ref, agg_ref, w_ref):
    # x_ref:   (TB, S, H)  input tile, native dtype (H on lanes, S on sublanes)
    # q_ref:   (1, H)      learned query row (f32), shared across grid steps
    # agg_ref: (TB, H)     aggregated output tile
    # w_ref:   (TB, S)     attention-weight output tile
    x = x_ref[...].astype(jnp.float32)            # upcast hides under the DMA
    q = q_ref[...]                                 # (1, H) broadcasts over (TB, S, H)

    # Attention scores: VPU elementwise mul + lane (H) reduce on the XLU slot.
    scores = jnp.sum(x * q, axis=-1)               # (TB, S)

    # Numerically-stable softmax over the sequence axis.
    m = jnp.max(scores, axis=-1, keepdims=True)    # (TB, 1)
    e = jnp.exp(scores - m)                        # (TB, S)
    denom = jnp.sum(e, axis=-1, keepdims=True)     # (TB, 1)
    # Exact reciprocal keeps tight numerics; pl.reciprocal(denom, approx=True)
    # is a free EUP alternative once the kernel sits at the HBM roofline.
    w = e * (1.0 / denom)                          # (TB, S)

    # Weighted sum over the sequence axis -> (TB, H).
    agg = jnp.sum(w[:, :, None] * x, axis=1)

    agg_ref[...] = agg.astype(agg_ref.dtype)
    w_ref[...] = w.astype(w_ref.dtype)


def _round_up(n, m):
    return ((n + m - 1) // m) * m


def learned_attention_aggregator(x, query, *, target_tile_bytes=2 * 1024 * 1024):
    """x: (B, S, H), query: (H,) -> (agg (B, H), weights (B, S))."""
    B, S, H = x.shape
    out_dtype = x.dtype

    # Batch tile: multiple of 8 sublanes, sized for ~target_tile_bytes of input
    # per grid step (double-buffered by Pallas), clamped so tiny batches are
    # not over-padded. Stays well under the scoped-VMEM limit on v5e/v6e/v7x.
    bytes_per_row = max(1, S * H * x.dtype.itemsize)
    tb = max(1, target_tile_bytes // bytes_per_row)
    tb = max(8, (tb // 8) * 8)
    tb = min(tb, _round_up(B, 8))

    b_pad = _round_up(B, tb)
    if b_pad != B:
        # Zero rows give uniform (harmless) softmax weights; sliced off below.
        x = jnp.pad(x, ((0, b_pad - B), (0, 0), (0, 0)))

    q_row = query.reshape(1, H).astype(jnp.float32)

    # TODO(synk): for real workloads with H not a multiple of 128 (or odd S),
    # consider pre-padding H/S at the wrapper (masking padded scores to -inf)
    # to keep every load/store lane-dense; full-extent blocks used here are
    # correct for arbitrary S, H.
    agg, w = pl.pallas_call(
        _attn_agg_kernel,
        out_shape=(
            jax.ShapeDtypeStruct((b_pad, H), out_dtype),
            jax.ShapeDtypeStruct((b_pad, S), out_dtype),
        ),
        grid_spec=pltpu.PrefetchScalarGridSpec(
            num_scalar_prefetch=0,
            grid=(b_pad // tb,),
            in_specs=[
                pl.BlockSpec((tb, S, H), lambda b: (b, 0, 0)),   # x tile
                pl.BlockSpec((1, H), lambda b: (0, 0)),          # query (shared)
            ],
            out_specs=[
                pl.BlockSpec((tb, H), lambda b: (b, 0)),         # aggregated
                pl.BlockSpec((tb, S), lambda b: (b, 0)),         # attention weights
            ],
        ),
        compiler_params=pltpu.CompilerParams(
            dimension_semantics=("parallel",),     # megacore-shard batch on v7x
            vmem_limit_bytes=48 * 1024 * 1024,     # headroom over default scoped limit
        ),
    )(x, q_row)

    return agg[:B], w[:B]


def _reference(x, query):
    scores = jnp.einsum("bsh,h->bs", x, query)
    weights = jax.nn.softmax(scores, axis=1)
    agg = jnp.einsum("bs,bsh->bh", weights, x)
    return agg, weights


if __name__ == "__main__":
    B, S, H = 2, 8, 32

    key = jax.random.PRNGKey(0)
    kx, kq = jax.random.split(key)
    x = jax.random.normal(kx, (B, S, H), dtype=jnp.float32)
    # Deterministic synthetic init of the learned query parameter
    # (stands in for torch.manual_seed(42); torch.randn(hidden_size)).
    query = jax.random.normal(kq, (H,), dtype=jnp.float32)

    agg, weights = learned_attention_aggregator(x, query)
    jax.block_until_ready((agg, weights))

    ref_agg, ref_w = _reference(x, query)
    assert agg.shape == (B, H) and weights.shape == (B, S)
    assert jnp.allclose(agg, ref_agg, atol=1e-5, rtol=1e-5)
    assert jnp.allclose(weights, ref_w, atol=1e-5, rtol=1e-5)

    print("KERNEL_OK")
</pallas_src>

<mosaic_0001>
module attributes {stable_mosaic.version = 11 : i64} {
  func.func @_attn_agg_kernel(%arg0: i32, %arg1: memref<8x8x32xf32, #tpu.memory_space<vmem>>, %arg2: memref<1x32xf32, #tpu.memory_space<vmem>>, %arg3: memref<8x32xf32, #tpu.memory_space<vmem>>, %arg4: memref<8x8xf32, #tpu.memory_space<vmem>>) attributes {dimension_semantics = [#tpu.dimension_semantics<parallel>], iteration_bounds = array<i64: 1>, scalar_prefetch = 0 : i64, scratch_operands = 0 : i64, tpu.core_type = #tpu.core_type<tc>, window_params = [{transform_indices = @transform_0, window_bounds = array<i64: 8, 8, 32>}, {pipeline_mode = #tpu.pipeline_mode<synchronous>, transform_indices = @transform_1, window_bounds = array<i64: 1, 32>}, {transform_indices = @transform_2, window_bounds = array<i64: 8, 32>}, {transform_indices = @transform_3, window_bounds = array<i64: 8, 8>}]} {
    %c0 = arith.constant 0 : index
    %c0_0 = arith.constant 0 : index
    %c0_1 = arith.constant 0 : index
    %0 = vector.load %arg1[%c0, %c0_0, %c0_1] : memref<8x8x32xf32, #tpu.memory_space<vmem>>, vector<8x8x32xf32>
    %c0_2 = arith.constant 0 : index
    %c0_3 = arith.constant 0 : index
    %1 = vector.load %arg2[%c0_2, %c0_3] : memref<1x32xf32, #tpu.memory_space<vmem>>, vector<1x32xf32>
    %2 = vector.shape_cast %1 : vector<1x32xf32> to vector<1x1x32xf32>
    %3 = vector.broadcast %2 : vector<1x1x32xf32> to vector<8x8x32xf32>
    %4 = arith.mulf %0, %3 : vector<8x8x32xf32>
    %cst = arith.constant dense<0.000000e+00> : vector<8x8xf32>
    %5 = vector.multi_reduction <add>, %4, %cst [2] : vector<8x8x32xf32> to vector<8x8xf32>
    %cst_4 = arith.constant dense<0xFF800000> : vector<8xf32>
    %6 = vector.multi_reduction <maximumf>, %5, %cst_4 [1] : vector<8x8xf32> to vector<8xf32>
    %7 = vector.shape_cast %6 : vector<8xf32> to vector<8x1xf32>
    %8 = vector.broadcast %7 : vector<8x1xf32> to vector<8x8xf32>
    %9 = arith.subf %5, %8 : vector<8x8xf32>
    %10 = math.exp %9 : vector<8x8xf32>
    %cst_5 = arith.constant dense<0.000000e+00> : vector<8xf32>
    %11 = vector.multi_reduction <add>, %10, %cst_5 [1] : vector<8x8xf32> to vector<8xf32>
    %12 = vector.shape_cast %11 : vector<8xf32> to vector<8x1xf32>
    %cst_6 = arith.constant 1.000000e+00 : f32
    %13 = vector.broadcast %cst_6 : f32 to vector<8x1xf32>
    %14 = arith.divf %13, %12 : vector<8x1xf32>
    %15 = vector.broadcast %14 : vector<8x1xf32> to vector<8x8xf32>
    %16 = arith.mulf %10, %15 : vector<8x8xf32>
    %17 = vector.shape_cast %16 : vector<8x8xf32> to vector<8x8x1xf32>
    %18 = vector.broadcast %17 : vector<8x8x1xf32> to vector<8x8x32xf32>
    %19 = arith.mulf %18, %0 : vector<8x8x32xf32>
    %cst_7 = arith.constant dense<0.000000e+00> : vector<8x32xf32>
    %20 = vector.multi_reduction <add>, %19, %cst_7 [1] : vector<8x8x32xf32> to vector<8x32xf32>
    %c0_8 = arith.constant 0 : index
    %c0_9 = arith.constant 0 : index
    %21 = vector.load %arg3[%c0_8, %c0_9] : memref<8x32xf32, #tpu.memory_space<vmem>>, vector<8x32xf32>
    tpu.vector_store %arg3[%c0_8, %c0_9], %20 {strides = array<i32>} : memref<8x32xf32, #tpu.memory_space<vmem>>, vector<8x32xf32>,
    %c0_10 = arith.constant 0 : index
    %c0_11 = arith.constant 0 : index
    %22 = vector.load %arg4[%c0_10, %c0_11] : memref<8x8xf32, #tpu.memory_space<vmem>>, vector<8x8xf32>
    tpu.vector_store %arg4[%c0_10, %c0_11], %16 {strides = array<i32>} : memref<8x8xf32, #tpu.memory_space<vmem>>, vector<8x8xf32>,
    return
  }
  func.func @transform_0(%arg0: i32) -> (i32, i32, i32) {
    %c0_i32 = arith.constant 0 : i32
    %c0_i32_0 = arith.constant 0 : i32
    %c0_i32_1 = arith.constant 0 : i32
    return %arg0, %c0_i32, %c0_i32_0 : i32, i32, i32
  }
  func.func @transform_1(%arg0: i32) -> (i32, i32) {
    %c0_i32 = arith.constant 0 : i32
    %c0_i32_0 = arith.constant 0 : i32
    %c0_i32_1 = arith.constant 0 : i32
    return %c0_i32, %c0_i32_0 : i32, i32
  }
  func.func @transform_2(%arg0: i32) -> (i32, i32) {
    %c0_i32 = arith.constant 0 : i32
    %c0_i32_0 = arith.constant 0 : i32
    return %arg0, %c0_i32 : i32, i32
  }
  func.func @transform_3(%arg0: i32) -> (i32, i32) {
    %c0_i32 = arith.constant 0 : i32
    %c0_i32_0 = arith.constant 0 : i32
    return %arg0, %c0_i32 : i32, i32
  }
}

</mosaic_0001>

<bundles_post_ra>
// kernel: tpu_custom_call.1
= control target key start
LH: loop header
LB: loop body
LE: loop exit
PB: predicated region body
PF: predicated region fallthrough
CT: control target
= control target key end

     0   :  { %9 = vsyncpa [#allocation3], 0  ;;  %s833_s0 = inlined_call_operand.hbm [shape: f32[8,8,32], index: 0, kind: input, shape index: {}]   ;;  %s834_s1 = inlined_call_operand.vmem [shape: f32[1,32], index: 1, kind: input, shape index: {}]   ;;  %s835_s2 = inlined_call_operand.hbm [shape: f32[8,32], index: 2, kind: output, shape index: {0}]   ;;  %s836_s3 = inlined_call_operand.hbm [shape: f32[8,8], index: 3, kind: output, shape index: {1}]  }
   0x1   :  { %10 = vsyncpa [#allocation4], 0 }
   0x2   :  { %11 = vsyncpa [#allocation7], 0  ;;  %s619_s12 = smov [#allocation2]   ;;  %s547_s16 = scalar_lea.hbm %s833_s0, 1024 }
   0x3   :  { %s17_s13 = sshll.u32 %s619_s12, 4  ;;  %p548_p0 = scmp.ne.s32.totalorder %s833_s0, %s547_s16  ;;  %s18_s13 = int_to_ptr.vmem [resolvable:$true] %s17_s13 }
   0x4   :  { %p551_p1 = scmp.lt.u32.totalorder %s547_s16, %s833_s0 }
   0x6   :  { %p553_p2 = pnand %p551_p1, %p548_p0 }
   0x8   :  { %556 = shalt.err (!%p553_p2)
}
   0x9   :  { %s557_s21 = scalar_lea.vmem %s18_s13, 1024  ;;  %p562_p4 = scmp.lt.s32.totalorder %s18_s13, %s18_s13 }
   0xa   :  { %p558_p3 = scmp.ne.s32.totalorder %s18_s13, %s557_s21  ;;  %p563_p5 = scmp.lt.s32.totalorder %s557_s21, %s557_s21 }
   0xc   :  { %p564_p6 = por %p563_p5, %p562_p4 }
   0xe   :  { %p565_p7 = pnand %p564_p6, %p558_p3 }
  0x10   :  { %568 = shalt.err (!%p565_p7)
}
  0x11   :  { %s620_s22 = smov 128   ;;  %s621_s23 = smov 8  }
  0x12   :  { %23 = dma.hbm_to_vmem [thread:$0]  %s833_s0, 1024, %s18_s13, [#allocation3], %s620_s22, %s620_s22, %s621_s23  }
  0x13   :  { %613 = dma.done.wait [#allocation3], 1024  }
  0x14   :  { %614 = vsyncadd [#allocation3], 4294966272  ;;  %v657_v0 = vld [vmem:[#allocation2] sm:$0xff]  ;;  %vm52_vm0 = vcmask 261120   ;;  %v662_v2 = vld [vmem:[#allocation2 + $0x10] sm:$0xff]  ;;  %v85_v25 = vlaneseq  ;;  %vm119_vm1 = vcmask 1041409  }
  0x15   :  { %v520_v1 = vld [vmem:[%s834_s1] ss:$0 sm:$0xff]  ;;  %v666_v5 = vld [vmem:[#allocation2 + $0x8] sm:$0xff]  ;;  %v668_v6 = vld [vmem:[#allocation2 + $0x18] sm:$0xff]  ;;  %vm121_vm2 = vcmask 1042434   ;;  %vm123_vm3 = vcmask 1043459  }
  0x16   :  { %v44_v3 = vmul.f32 %v520_v1, %v657_v0  ;;  %v46_v4 = vmul.f32 %v520_v1, %v662_v2  ;;  %v45_v7 = vmul.f32 %v520_v1, %v666_v5  ;;  %v47_v8 = vmul.f32 %v520_v1, %v668_v6  ;;  %v672_v9 = vld [vmem:[#allocation2 + $0x20] sm:$0xff]  ;;  %v674_v10 = vld [vmem:[#allocation2 + $0x28] sm:$0xff]  ;;  %v682_v17 = vld [vmem:[#allocation2 + $0x30] sm:$0xff]  ;;  %s623_s0 = smov [#allocation6]  }
  0x17   :  { %v48_v15 = vmul.f32 %v520_v1, %v672_v9  ;;  %v49_v16 = vmul.f32 %v520_v1, %v674_v10  ;;  %v684_v18 = vld [vmem:[#allocation2 + $0x38] sm:$0xff]  ;;  %v50_v21 = vmul.f32 %v520_v1, %v682_v17  ;;  %v86_v26 = vand.u32 127, %v85_v25  ;;  %s507_s1 = sshll.u32 %s623_s0, 4  ;;  %s508_s1 = int_to_ptr.vmem [resolvable:$true] %s507_s1 }
  0x18   :  { %v53_v11 = vsel %vm52_vm0, %v44_v3, 0.0  ;;  %v59_v12 = vsel %vm52_vm0, %v46_v4, 0.0  ;;  %v56_v13 = vsel %vm52_vm0, %v45_v7, 0.0  ;;  %v62_v14 = vsel %vm52_vm0, %v47_v8, 0.0  ;;  %s569_s28 = scalar_lea.vmem %s508_s1, 128  ;;  %p574_p9 = scmp.lt.s32.totalorder %s508_s1, %s508_s1 }
  0x19   :  { %54 = vadd.xlane.f32.xlu0 %v53_v11  ;;  %60 = vadd.xlane.f32.xlu1 %v59_v12  ;;  %v65_v19 = vsel %vm52_vm0, %v48_v15, 0.0  ;;  %v68_v20 = vsel %vm52_vm0, %v49_v16, 0.0  ;;  %v51_v22 = vmul.f32 %v520_v1, %v684_v18  ;;  %v71_v23 = vsel %vm52_vm0, %v50_v21, 0.0  ;;  %p570_p8 = scmp.ne.s32.totalorder %s508_s1, %s569_s28  ;;  %p575_p10 = scmp.lt.s32.totalorder %s569_s28, %s569_s28 }
  0x1a   :  { %v692_v27 = vshrl.u32 %v85_v25, 7  ;;  %vm125_vm4 = vcmask 1044484   ;;  %vm127_vm5 = vcmask 1045509   ;;  %vm129_vm6 = vcmask 1046534  }
  0x1b   :  { %v74_v24 = vsel %vm52_vm0, %v51_v22, 0.0  ;;  %vm131_vm7 = vcmask 1047559   ;;  %vm134_vm8 = vcmask 64512   ;;  %v622_v53 = vmov 0   ;;  %p576_p11 = por %p575_p10, %p574_p9 }
  0x1c   :  { %v695_v30 = vsub.s32 %v86_v26, %v692_v27  ;;  %528 = vset.pattern.permute.xlu0 %v622_v53  ;;  %527 = vset.pattern.permute.xlu1 %v622_v53  ;;  %v141_v54 = vsub.s32 0, %v692_v27  ;;  %v145_v55 = vsub.s32 1, %v692_v27  ;;  %v149_v56 = vsub.s32 2, %v692_v27 }
  0x1d   :  { %57 = vadd.xlane.f32.xlu0 %v56_v13  ;;  %63 = vadd.xlane.f32.xlu1 %v62_v14  ;;  %v153_v57 = vsub.s32 3, %v692_v27  ;;  %v157_v62 = vsub.s32 4, %v692_v27  ;;  %v161_v11 = vsub.s32 5, %v692_v27  ;;  %v165_v15 = vsub.s32 6, %v692_v27  ;;  %p577_p12 = pnand %p576_p11, %p570_p8 }
  0x1e   :  { %v169_v21 = vsub.s32 7, %v692_v27 }
  0x21   :  { %66 = vadd.xlane.f32.xlu0 %v65_v19  ;;  %69 = vadd.xlane.f32.xlu1 %v68_v20 }
  0x25   :  { %72 = vadd.xlane.f32.xlu0 %v71_v23  ;;  %75 = vadd.xlane.f32.xlu1 %v74_v24 }
  0xa6   :  { %v55_v28 = vpop.xlane.xlu0 %54  ;;  %v61_v29 = vpop.xlane.xlu1 %60 }
  0xa7   :  { %v90_v33 = vrot.slane %v55_v28, %v695_v30  ;;  %v98_v36 = vrot.slane %v61_v29, %v695_v30 }
  0xaa   :  { %v58_v31 = vpop.xlane.xlu0 %57  ;;  %v64_v32 = vpop.xlane.xlu1 %63 }
  0xab   :  { %v94_v34 = vrot.slane %v58_v31, %v695_v30  ;;  %v102_v35 = vrot.slane %v64_v32, %v695_v30 }
  0xad   :  { %v120_v37 = vsel %vm119_vm1, %v94_v34, %v90_v33 }
  0xae   :  { %v122_v38 = vsel %vm121_vm2, %v98_v36, %v120_v37  ;;  %v67_v39 = vpop.xlane.xlu0 %66  ;;  %v70_v40 = vpop.xlane.xlu1 %69 }
  0xaf   :  { %v124_v41 = vsel %vm123_vm3, %v102_v35, %v122_v38  ;;  %v106_v42 = vrot.slane %v67_v39, %v695_v30  ;;  %v110_v43 = vrot.slane %v70_v40, %v695_v30 }
  0xb1   :  { %v126_v44 = vsel %vm125_vm4, %v106_v42, %v124_v41 }
  0xb2   :  { %v73_v45 = vpop.xlane.xlu0 %72  ;;  %v76_v46 = vpop.xlane.xlu1 %75  ;;  %v128_v49 = vsel %vm127_vm5, %v110_v43, %v126_v44 }
  0xb3   :  { %v114_v47 = vrot.slane %v73_v45, %v695_v30  ;;  %v118_v48 = vrot.slane %v76_v46, %v695_v30 }
  0xb5   :  { %v130_v50 = vsel %vm129_vm6, %v114_v47, %v128_v49 }
  0xb6   :  { %v132_v51 = vsel %vm131_vm7, %v118_v48, %v130_v50 }
  0xb7   :  { %v135_v52 = vsel %vm134_vm8, %v132_v51, -inf }
  0xb8   :  { %136 = vmax.xlane.f32.xlu0 %v135_v52 }
 0x145   :  { %v137_v58 = vpop.xlane.xlu0 %136 }
 0x146   :  { %v142_v59 = vrot.slane %v137_v58, %v141_v54  ;;  %v146_v60 = vrot.slane %v137_v58, %v145_v55  ;;  %v150_v61 = vrot.slane %v137_v58, %v149_v56  ;;  %v154_v63 = vrot.slane %v137_v58, %v153_v57 }
 0x147   :  { %v158_v12 = vrot.slane %v137_v58, %v157_v62  ;;  %v162_v16 = vrot.slane %v137_v58, %v161_v11  ;;  %v166_v22 = vrot.slane %v137_v58, %v165_v15 }
 0x148   :  { %v179_v1 = vsub.f32 %v55_v28, %v142_v59  ;;  %v180_v3 = vsub.f32 %v58_v31, %v146_v60  ;;  %v181_v4 = vsub.f32 %v61_v29, %v150_v61  ;;  %v182_v13 = vsub.f32 %v64_v32, %v154_v63 }
 0x149   :  { %v183_v19 = vsub.f32 %v67_v39, %v158_v12  ;;  %v184_v23 = vsub.f32 %v70_v40, %v162_v16  ;;  %v170_v28 = vrot.slane %v137_v58, %v169_v21  ;;  %v185_v29 = vsub.f32 %v73_v45, %v166_v22 }
 0x14a   :  { %v187_v7 = vmul.f32 1.442695, %v179_v1  ;;  %v189_v8 = vmul.f32 1.442695, %v180_v3  ;;  %v191_v14 = vmul.f32 1.442695, %v181_v4 }
 0x14b   :  { %v193_v20 = vmul.f32 1.442695, %v182_v13  ;;  %v195_v24 = vmul.f32 1.442695, %v183_v19  ;;  %v197_v31 = vmul.f32 1.442695, %v184_v23  ;;  %v186_v33 = vsub.f32 %v76_v46, %v170_v28 }
 0x14c   :  { %529 = vpow2.f32 %v187_v7  ;;  %v199_v34 = vmul.f32 1.442695, %v185_v29 }
 0x14d   :  { %531 = vpow2.f32 %v189_v8  ;;  %v201_v36 = vmul.f32 1.442695, %v186_v33 }
 0x14e   :  { %533 = vpow2.f32 %v191_v14 }
 0x14f   :  { %535 = vpow2.f32 %v193_v20 }
 0x150   :  { %537 = vpow2.f32 %v195_v24 }
 0x151   :  { %539 = vpow2.f32 %v197_v31 }
 0x152   :  { %541 = vpow2.f32 %v199_v34 }
 0x153   :  { %543 = vpow2.f32 %v201_v36 }
 0x156   :  { %v530_v25 = vpop.eup %529 }
 0x157   :  { %v532_v26 = vpop.eup %531  ;;  %212 = vperm.xlu1 %527, %v530_v25  }
 0x158   :  { %215 = vperm.xlu0 %528, %v532_v26   ;;  %v534_v32 = vpop.eup %533 }
 0x159   :  { %v536_v35 = vpop.eup %535 }
 0x15a   :  { %v538_v37 = vpop.eup %537 }
 0x15b   :  { %218 = vperm.xlu1 %527, %v534_v32   ;;  %v540_v38 = vpop.eup %539 }
 0x15c   :  { %v542_v39 = vpop.eup %541 }
 0x15d   :  { %v544_v40 = vpop.eup %543 }
 0x15f   :  { %221 = vperm.xlu1 %527, %v536_v35  }
 0x163   :  { %224 = vperm.xlu1 %527, %v538_v37  }
 0x167   :  { %227 = vperm.xlu1 %527, %v540_v38  }
 0x16b   :  { %230 = vperm.xlu1 %527, %v542_v39  }
 0x16f   :  { %233 = vperm.xlu1 %527, %v544_v40  }
 0x1d6   :  { %v213_v41 = vpop.permute.xlu1 %212 }
 0x1d7   :  { %v216_v45 = vpop.permute.xlu0 %215  ;;  %v238_v48 = vrot.slane %v213_v41, %v695_v30 }
 0x1d8   :  { %v242_v47 = vrot.slane %v216_v45, %v695_v30 }
 0x1da   :  { %v219_v42 = vpop.permute.xlu1 %218  ;;  %v267_v53 = vsel %vm119_vm1, %v242_v47, %v238_v48 }
 0x1db   :  { %v246_v49 = vrot.slane %v219_v42, %v695_v30 }
 0x1dd   :  { %v268_v59 = vsel %vm121_vm2, %v246_v49, %v267_v53 }
 0x1de   :  { %v222_v43 = vpop.permute.xlu1 %221 }
 0x1df   :  { %v250_v50 = vrot.slane %v222_v43, %v695_v30 }
 0x1e1   :  { %v269_v61 = vsel %vm123_vm3, %v250_v50, %v268_v59 }
 0x1e2   :  { %v225_v44 = vpop.permute.xlu1 %224 }
 0x1e3   :  { %v254_v51 = vrot.slane %v225_v44, %v695_v30 }
 0x1e5   :  { %v270_v63 = vsel %vm125_vm4, %v254_v51, %v269_v61 }
 0x1e6   :  { %v228_v46 = vpop.permute.xlu1 %227 }
 0x1e7   :  { %v258_v58 = vrot.slane %v228_v46, %v695_v30 }
 0x1e9   :  { %v271_v3 = vsel %vm127_vm5, %v258_v58, %v270_v63 }
 0x1ea   :  { %v231_v52 = vpop.permute.xlu1 %230 }
 0x1eb   :  { %v262_v60 = vrot.slane %v231_v52, %v695_v30 }
 0x1ed   :  { %v272_v7 = vsel %vm129_vm6, %v262_v60, %v271_v3 }
 0x1ee   :  { %v234_v1 = vpop.permute.xlu1 %233 }
 0x1ef   :  { %v266_v4 = vrot.slane %v234_v1, %v695_v30 }
 0x1f1   :  { %v273_v8 = vsel %vm131_vm7, %v266_v4, %v272_v7 }
 0x1f2   :  { %v275_v12 = vsel %vm134_vm8, %v273_v8, 0.0 }
 0x1f3   :  { %276 = vadd.xlane.f32.xlu1 %v275_v12 }
 0x280   :  { %v277_v13 = vpop.xlane.xlu1 %276 }
 0x281   :  { %545 = vrcp.f32 %v277_v13 }
 0x28b   :  { %v546_v14 = vpop.eup %545 }
 0x28c   :  { %v284_v16 = vrot.slane %v546_v14, %v141_v54  ;;  %v288_v20 = vrot.slane %v546_v14, %v145_v55  ;;  %v292_v23 = vrot.slane %v546_v14, %v149_v56  ;;  %v296_v28 = vrot.slane %v546_v14, %v153_v57 }
 0x28d   :  { %v300_v31 = vrot.slane %v546_v14, %v157_v62  ;;  %v304_v55 = vrot.slane %v546_v14, %v161_v11  ;;  %v308_v56 = vrot.slane %v546_v14, %v165_v15  ;;  %v312_v57 = vrot.slane %v546_v14, %v169_v21 }
 0x28e   :  { %v321_v19 = vmul.f32 %v530_v25, %v284_v16  ;;  %v322_v22 = vmul.f32 %v532_v26, %v288_v20  ;;  %v323_v24 = vmul.f32 %v534_v32, %v292_v23  ;;  %v324_v29 = vmul.f32 %v536_v35, %v296_v28 }
 0x28f   :  { %v325_v54 = vmul.f32 %v538_v37, %v300_v31  ;;  %v326_v25 = vmul.f32 %v540_v38, %v304_v55  ;;  %v327_v26 = vmul.f32 %v542_v39, %v308_v56  ;;  %v328_v32 = vmul.f32 %v544_v40, %v312_v57 }
 0x290   :  { %331 = vperm.xlu0 %528, %v321_v19  }
 0x294   :  { %336 = vperm.xlu0 %528, %v322_v22  }
 0x298   :  { %341 = vperm.xlu0 %528, %v323_v24  }
 0x29c   :  { %346 = vperm.xlu0 %528, %v324_v29  }
 0x2a0   :  { %351 = vperm.xlu0 %528, %v325_v54  }
 0x2a4   :  { %356 = vperm.xlu0 %528, %v326_v25  }
 0x2a8   :  { %361 = vperm.xlu0 %528, %v327_v26  }
 0x2ac   :  { %366 = vperm.xlu0 %528, %v328_v32  }
 0x30f   :  { %v332_v33 = vpop.permute.xlu0 %331 }
 0x310   :  { %v369_v35 = vmul.f32 %v332_v33, %v657_v0  ;;  %v453_v51 = vrot.slane %v332_v33, %v695_v30 }
 0x312   :  { %v377_v15 = vsel %vm52_vm0, %v369_v35, 0.0 }
 0x313   :  { %v337_v62 = vpop.permute.xlu0 %336  ;;  %v378_v40 = vrot.slane %v377_v15, 4 }
 0x314   :  { %v370_v34 = vmul.f32 %v337_v62, %v666_v5  ;;  %v457_v50 = vrot.slane %v337_v62, %v695_v30 }
 0x316   :  { %v384_v37 = vsel %vm52_vm0, %v370_v34, 0.0  ;;  %v482_v7 = vsel %vm119_vm1, %v457_v50, %v453_v51 }
 0x317   :  { %v342_v11 = vpop.permute.xlu0 %341  ;;  %v385_v39 = vrot.slane %v384_v37, 4 }
 0x318   :  { %v371_v36 = vmul.f32 %v342_v11, %v662_v2  ;;  %v379_v2 = vadd.f32 %v378_v40, %v377_v15  ;;  %v461_v53 = vrot.slane %v342_v11, %v695_v30 }
 0x319   :  { %v386_v44 = vadd.f32 %v385_v39, %v384_v37 }
 0x31a   :  { %v391_v38 = vsel %vm52_vm0, %v371_v36, 0.0  ;;  %v380_v59 = vrot.slane %v379_v2, 2  ;;  %v483_v14 = vsel %vm121_vm2, %v461_v53, %v482_v7 }
 0x31b   :  { %v347_v27 = vpop.permute.xlu0 %346  ;;  %v392_v41 = vrot.slane %v391_v38, 4  ;;  %v387_v52 = vrot.slane %v386_v44, 2 }
 0x31c   :  { %v372_v21 = vmul.f32 %v347_v27, %v668_v6  ;;  %v465_v60 = vrot.slane %v347_v27, %v695_v30  ;;  %v381_v20 = vadd.f32 %v380_v59, %v379_v2 }
 0x31d   :  { %v393_v45 = vadd.f32 %v392_v41, %v391_v38  ;;  %v388_v13 = vadd.f32 %v387_v52, %v386_v44 }
 0x31e   :  { %v398_v42 = vsel %vm52_vm0, %v372_v21, 0.0  ;;  %v484_v23 = vsel %vm123_vm3, %v465_v60, %v483_v14  ;;  %v382_v36 = vrot.slane %v381_v20, 1 }
 0x31f   :  { %v399_v5 = vrot.slane %v398_v42, 4  ;;  %v352_v43 = vpop.permute.xlu0 %351  ;;  %v389_v57 = vrot.slane %v388_v13, 1 }
 0x320   :  { %v373_v0 = vmul.f32 %v352_v43, %v672_v9  ;;  %v394_v9 = vrot.slane %v393_v45, 2  ;;  %v469_v1 = vrot.slane %v352_v43, %v695_v30 }
 0x321   :  { %v400_v47 = vadd.f32 %v399_v5, %v398_v42 }
 0x322   :  { %v405_v46 = vsel %vm52_vm0, %v373_v0, 0.0  ;;  %v395_v22 = vadd.f32 %v394_v9, %v393_v45  ;;  %v485_v29 = vsel %vm125_vm4, %v469_v1, %v484_v23 }
 0x323   :  { %v406_v48 = vrot.slane %v405_v46, 4  ;;  %v357_v49 = vpop.permute.xlu0 %356  ;;  %v401_v63 = vrot.slane %v400_v47, 2 }
 0x324   :  { %v374_v6 = vmul.f32 %v357_v49, %v674_v10  ;;  %v473_v8 = vrot.slane %v357_v49, %v695_v30  ;;  %v396_v34 = vrot.slane %v395_v22, 1 }
 0x325   :  { %v407_v58 = vadd.f32 %v406_v48, %v405_v46  ;;  %v402_v28 = vadd.f32 %v401_v63, %v400_v47 }
 0x326   :  { %v412_v61 = vsel %vm52_vm0, %v374_v6, 0.0  ;;  %v486_v25 = vsel %vm127_vm5, %v473_v8, %v485_v29 }
 0x327   :  { %v413_v3 = vrot.slane %v412_v61, 4  ;;  %v362_v4 = vpop.permute.xlu0 %361  ;;  %v408_v10 = vrot.slane %v407_v58, 2  ;;  %v403_v37 = vrot.slane %v402_v28, 1 }
 0x328   :  { %v375_v12 = vmul.f32 %v362_v4, %v682_v17  ;;  %v477_v19 = vrot.slane %v362_v4, %v695_v30 }
 0x329   :  { %v414_v16 = vadd.f32 %v413_v3, %v412_v61  ;;  %v409_v55 = vadd.f32 %v408_v10, %v407_v58 }
 0x32a   :  { %v419_v24 = vsel %vm52_vm0, %v375_v12, 0.0  ;;  %v487_v62 = vsel %vm129_vm6, %v477_v19, %v486_v25 }
 0x32b   :  { %v415_v31 = vrot.slane %v414_v16, 2  ;;  %v420_v54 = vrot.slane %v419_v24, 4  ;;  %v367_v17 = vpop.permute.xlu0 %366 }
 0x32c   :  { %v376_v56 = vmul.f32 %v367_v17, %v684_v18  ;;  %v481_v26 = vrot.slane %v367_v17, %v695_v30  ;;  %v410_v18 = vrot.slane %v409_v55, 1 }
 0x32d   :  { %v416_v32 = vadd.f32 %v415_v31, %v414_v16  ;;  %v421_v33 = vadd.f32 %v420_v54, %v419_v24 }
 0x32e   :  { %v426_v35 = vsel %vm52_vm0, %v376_v56, 0.0  ;;  %v488_v11 = vsel %vm131_vm7, %v481_v26, %v487_v62 }
 0x32f   :  { %v422_v15 = vrot.slane %v421_v33, 2  ;;  %v427_v38 = vrot.slane %v426_v35, 4  ;;  %490 = vst.msk [vmem:[#allocation6] sm:$0xff] %vm134_vm8, %v488_v11 }
 0x330   :  { %580 = shalt.err (!%p577_p12)
}
 0x331   :  { %s581_s4 = scalar_lea.hbm %s836_s3, 128 }
 0x332   :  { %p582_p13 = scmp.ne.s32.totalorder %s836_s3, %s581_s4  ;;  %p585_p0 = scmp.lt.u32.totalorder %s581_s4, %s836_s3 }
 0x334   :  { %p587_p1 = pnand %p585_p0, %p582_p13 }
 0x336   :  { %590 = shalt.err (!%p587_p1)
}
 0x337   :  { %510 = dma.vmem_to_hbm [thread:$0]  %s508_s1, 128, %s836_s3, [#allocation7]   ;;  %v390_v30 = vadd.f32 %v389_v57, %v388_v13  ;;  %v417_v27 = vrot.slane %v416_v32, 1  ;;  %v423_v21 = vadd.f32 %v422_v15, %v421_v33  ;;  %v428_v39 = vadd.f32 %v427_v38, %v426_v35 }
 0x338   :  { %v397_v40 = vadd.f32 %v396_v34, %v395_v22  ;;  %v383_v41 = vadd.f32 %v382_v36, %v381_v20  ;;  %v404_v42 = vadd.f32 %v403_v37, %v402_v28  ;;  %v411_v0 = vadd.f32 %v410_v18, %v409_v55  ;;  %s624_s3 = smov [#allocation5]  }
 0x339   :  { %v424_v5 = vrot.slane %v423_v21, 1  ;;  %v429_v43 = vrot.slane %v428_v39, 2  ;;  %v418_v2 = vadd.f32 %v417_v27, %v416_v32  ;;  %s497_s11 = sshll.u32 %s624_s3, 4  ;;  %s498_s11 = int_to_ptr.vmem [resolvable:$true] %s497_s11 }
 0x33a   :  { %v441_v44 = vsel %vm119_vm1, %v390_v30, %v383_v41  ;;  %s591_s12 = scalar_lea.vmem %s498_s11, 128  ;;  %p596_p3 = scmp.lt.s32.totalorder %s498_s11, %s498_s11 }
 0x33b   :  { %v430_v45 = vadd.f32 %v429_v43, %v428_v39  ;;  %v442_v46 = vsel %vm121_vm2, %v397_v40, %v441_v44  ;;  %v425_v47 = vadd.f32 %v424_v5, %v423_v21  ;;  %p592_p2 = scmp.ne.s32.totalorder %s498_s11, %s591_s12  ;;  %p597_p4 = scmp.lt.s32.totalorder %s591_s12, %s591_s12 }
 0x33c   :  { %v443_v49 = vsel %vm123_vm3, %v404_v42, %v442_v46 }
 0x33d   :  { %v431_v48 = vrot.slane %v430_v45, 1  ;;  %v444_v50 = vsel %vm125_vm4, %v411_v0, %v443_v49  ;;  %p598_p5 = por %p597_p4, %p596_p3 }
 0x33e   :  { %v445_v51 = vsel %vm127_vm5, %v418_v2, %v444_v50 }
 0x33f   :  { %v432_v6 = vadd.f32 %v431_v48, %v430_v45  ;;  %v446_v52 = vsel %vm129_vm6, %v425_v47, %v445_v51  ;;  %p599_p6 = pnand %p598_p5, %p592_p2 }
 0x341   :  { %v447_v53 = vsel %vm131_vm7, %v432_v6, %v446_v52 }
 0x342   :  { %449 = vst.msk [vmem:[#allocation5] sm:$0xff] %vm52_vm0, %v447_v53 }
 0x343   :  { %602 = shalt.err (!%p599_p6)
}
 0x344   :  { %s603_s15 = scalar_lea.hbm %s835_s2, 128 }
 0x345   :  { %p604_p7 = scmp.ne.s32.totalorder %s835_s2, %s603_s15  ;;  %p607_p8 = scmp.lt.u32.totalorder %s603_s15, %s835_s2 }
 0x347   :  { %p609_p9 = pnand %p607_p8, %p604_p7 }
 0x349   :  { %612 = shalt.err (!%p609_p9)
}
 0x34a   :  { %500 = dma.vmem_to_hbm [thread:$0]  %s498_s11, 128, %s835_s2, [#allocation4]  }
 0x34b   :  { %615 = dma.done.wait [#allocation4], 128  }
 0x34c   :  { %616 = vsyncadd [#allocation4], 4294967168 }
 0x34d   :  { %617 = dma.done.wait [#allocation7], 128  }
 0x34e   :  { %618 = vsyncadd [#allocation7], 4294967168 }
 0x34f   :  { %517 = vsyncpa [#allocation3], 1 }
 0x350   :  { %518 = vsyncpa [#allocation4], 1 }
 0x351   :  { %519 = vsyncpa [#allocation7], 1 }

</bundles_post_ra>
